<compile_context>
chip_gen: v6e
topology: v6e:2x2x1
jax: 0.10.0
libtpu: 0.0.40
codegen_flags: <defaults>
</compile_context>

<pallas_src>
import functools

import jax
import jax.numpy as jnp
from jax.experimental import pallas as pl
from jax.experimental.pallas import tpu as pltpu

HIDDEN = 256      # multiple of 256 -> fills v6e/v7x MXU columns per pass
T_EMB_DIM = 16

VMEM_BUDGET_BYTES = 24 * 1024 * 1024   # tile-selection budget (fits v7x scoped 32 MiB)
VMEM_LIMIT_BYTES = 48 * 1024 * 1024    # explicit scoped limit: > v5e/v6e defaults,
                                       # < v7x 64 MiB physical


def _round_up(n, m):
    return ((n + m - 1) // m) * m


def _cdiv(a, b):
    return -(-a // b)


def _vmem_bytes(tb, tk, fc, hidden):
    """Conservative per-call VMEM estimate (double-buffered pipeline blocks)."""
    return (2 * tb * tk * 4            # x_flat blocks, f32, double-buffered
            + 2 * tk * hidden * 2      # W1x blocks, bf16, double-buffered over K
            + 2 * tb * fc * 4          # ct blocks, f32
            + 2 * fc * hidden * 2      # W1c (resident; counted 2x to be safe)
            + 4 * hidden * 4           # b1 + w2 (2 buffers each)
            + 2 * tb * 4               # out blocks
            + tb * hidden * 4)         # f32 accumulator scratch


def _choose_tiles(bp, fx, fc, hidden):
    # K tile: full fx when small; otherwise the largest multiple-of-128 divisor
    # of fx <= 2048 so K blocks are never ragged (a ragged K block would feed
    # garbage columns into the accumulation of *valid* rows).
    tk = fx
    if fx > 2048:
        for cand in range(2048, 127, -128):
            if fx % cand == 0:
                tk = cand
                break
        # else: no nice divisor -> keep tk = fx (single K block; budget loop
        # below compensates by shrinking TB).

    # Batch tile: as large as the VMEM budget allows (streaming-bound kernel).
    tb = min(_round_up(bp, 8), 1024)
    while tb > 8 and _vmem_bytes(tb, tk, fc, hidden) > VMEM_BUDGET_BYTES:
        tb = max(8, _round_up(tb // 2, 8))

    # v7x has 2 TensorCores sharing the chip: make sure the "parallel" batch
    # axis has >= 2 grid steps whenever the batch can be split.
    if bp > 8 and _cdiv(bp, tb) < 2:
        tb = max(8, _round_up(_cdiv(bp, 2), 8))
    return tb, tk


# ----------------------------------------------------------------------------
# Pallas kernel: fused 2-layer MLP value head on one (batch-tile, K-tile) step
#   acc += x_blk @ W1x_blk                       (TB, HIDDEN)  MXU, f32 acc
#   on last K step:
#     h   = relu(acc + ct @ W1c + b1)            (TB, HIDDEN)
#     val = sum(h * w2_row, -1) + b2             (TB, 1)       VPU mul + XLU reduce
# ----------------------------------------------------------------------------
def _value_mlp_kernel(x_ref, ct_ref, w1x_ref, w1c_ref, b1_ref, w2_ref, b2_ref,
                      out_ref, acc_ref):
    k = pl.program_id(1)

    @pl.when(k == 0)
    def _():
        acc_ref[...] = jnp.zeros_like(acc_ref)

    # The f32->bf16 cast of the big activation happens here (VPU) so the (B, F)
    # array is streamed from HBM exactly once -- no wrapper-side cast pass.
    x_bf16 = x_ref[...].astype(jnp.bfloat16)
    acc_ref[...] += jnp.dot(x_bf16, w1x_ref[...],
                            preferred_element_type=jnp.float32)

    @pl.when(k == pl.num_programs(1) - 1)
    def _():
        ct_bf16 = ct_ref[...].astype(jnp.bfloat16)
        h = acc_ref[...] + jnp.dot(ct_bf16, w1c_ref[...],
                                   preferred_element_type=jnp.float32)
        h = jnp.maximum(h + b1_ref[...], 0.0)
        # Second layer: an Nx1 MXU matmul wastes the MXU -> VPU mul + reduce.
        val = jnp.sum(h * w2_ref[...], axis=-1, keepdims=True) + b2_ref[0]
        out_ref[...] = val.astype(out_ref.dtype)


@functools.partial(jax.jit, static_argnames=("tb", "tk"))
def value_mlp_pallas(x_flat, ct, w1x, w1c, b1, w2, b2, *, tb, tk):
    bp, fx = x_flat.shape
    fc = ct.shape[1]
    hidden = w1x.shape[1]
    nb = _cdiv(bp, tb)
    nk = max(1, fx // tk)

    cost = pl.CostEstimate(
        flops=2 * bp * (fx + fc + 1) * hidden,
        transcendentals=0,
        bytes_accessed=(x_flat.size * x_flat.dtype.itemsize
                        + ct.size * ct.dtype.itemsize
                        + w1x.size * w1x.dtype.itemsize
                        + w1c.size * w1c.dtype.itemsize
                        + b1.size * b1.dtype.itemsize
                        + w2.size * w2.dtype.itemsize
                        + b2.size * b2.dtype.itemsize
                        + bp * 4),
    )

    return pl.pallas_call(
        _value_mlp_kernel,
        out_shape=jax.ShapeDtypeStruct((bp, 1), jnp.float32),
        grid=(nb, nk),
        in_specs=[
            # Activations: tiled over batch (and features) -> double-buffered.
            pl.BlockSpec((tb, tk), lambda i, k: (i, k)),
            pl.BlockSpec((tb, fc), lambda i, k: (i, 0)),
            # Weights: W1x tiled over K; the rest resident (constant index_map).
            pl.BlockSpec((tk, hidden), lambda i, k: (k, 0)),
            pl.BlockSpec((fc, hidden), lambda i, k: (0, 0)),
            pl.BlockSpec((1, hidden), lambda i, k: (0, 0)),
            pl.BlockSpec((1, hidden), lambda i, k: (0, 0)),
            # b2 scalar lives in SMEM: no padded VMEM tile / extra DMA per step.
            pl.BlockSpec(memory_space=pltpu.MemorySpace.SMEM),
        ],
        out_specs=pl.BlockSpec((tb, 1), lambda i, k: (i, 0)),
        scratch_shapes=[pltpu.VMEM((tb, hidden), jnp.float32)],
        compiler_params=pltpu.CompilerParams(
            dimension_semantics=("parallel", "arbitrary"),
            vmem_limit_bytes=VMEM_LIMIT_BYTES,
        ),
        cost_estimate=cost,
    )(x_flat, ct, w1x, w1c, b1, w2, b2)


# ----------------------------------------------------------------------------
# Glue: time embedding + small cond concat + ValueGuide.forward squeeze(-1)
# ----------------------------------------------------------------------------
def sinusoidal_time_embedding(t, dim=T_EMB_DIM):
    half = dim // 2
    freqs = jnp.exp(
        -jnp.log(10000.0) * jnp.arange(half, dtype=jnp.float32) / max(half - 1, 1))
    args = t.astype(jnp.float32)[:, None] * freqs[None, :]
    return jnp.concatenate([jnp.sin(args), jnp.cos(args)], axis=-1)


def value_guide_forward(params, x, cond, t):
    """Equivalent of ValueGuide.forward: model(x, cond, t).squeeze(-1)."""
    w1x, w1c, b1, w2, b2 = params
    # Defensive: weights should already be bf16 (converted once at init).
    if w1x.dtype != jnp.bfloat16:
        w1x = w1x.astype(jnp.bfloat16)
    if w1c.dtype != jnp.bfloat16:
        w1c = w1c.astype(jnp.bfloat16)

    B = x.shape[0]
    x_flat = x.reshape(B, -1).astype(jnp.float32)               # (B, H*D) - big, stays f32
    temb = sinusoidal_time_embedding(t)                         # (B, 16)  - tiny
    ct = jnp.concatenate([cond.astype(jnp.float32), temb], -1)  # (B, C+16) - tiny

    tb, tk = _choose_tiles(B, x_flat.shape[1], ct.shape[1], w1x.shape[1])

    # No jnp.pad of the big activation: the ragged last batch tile is handled by
    # the pipeline (garbage rows only feed output rows sliced off below).
    out = value_mlp_pallas(x_flat, ct, w1x, w1c, b1, w2, b2, tb=tb, tk=tk)
    return out[:B, 0]                                           # squeeze(dim=-1)


# TODO(synk): ValueGuide.gradients uses torch.autograd through the inner model;
# differentiating through this pallas_call would need a custom_vjp (backward
# kernel or pure-JAX backward) and is not implemented here.


def init_params(key, x_feat_dim, ct_feat_dim, hidden=HIDDEN):
    k1, k2, k3 = jax.random.split(key, 3)
    # First-layer weights are stored in bf16 once (the MXU input dtype) so there
    # is no per-forward-call cast fusion.
    w1x = (jax.random.normal(k1, (x_feat_dim, hidden), jnp.float32) * 0.05
           ).astype(jnp.bfloat16)
    w1c = (jax.random.normal(k2, (ct_feat_dim, hidden), jnp.float32) * 0.05
           ).astype(jnp.bfloat16)
    b1 = jnp.zeros((1, hidden), jnp.float32)
    w2 = jax.random.normal(k3, (1, hidden), jnp.float32) * 0.05
    b2 = jnp.zeros((1,), jnp.float32)
    return (w1x, w1c, b1, w2, b2)


if __name__ == "__main__":
    key = jax.random.PRNGKey(0)
    kx, kc, kt, kp = jax.random.split(key, 4)

    B, H, D, C = 8, 16, 4, 4                  # batch, horizon, transition, cond
    x = jax.random.normal(kx, (B, H, D), jnp.float32)
    cond = jax.random.normal(kc, (B, C), jnp.float32)
    t = jax.random.randint(kt, (B,), 0, 100, jnp.int32)

    params = init_params(kp, H * D, C + T_EMB_DIM)

    y = jax.block_until_ready(value_guide_forward(params, x, cond, t))
    assert y.shape == (B,), y.shape

    # Pure-JAX f32 reference of the same math (kernel does bf16 matmul, f32 acc).
    w1x, w1c, b1, w2, b2 = params
    feat = jnp.concatenate(
        [x.reshape(B, -1), cond, sinusoidal_time_embedding(t)], axis=-1)
    w1 = jnp.concatenate([w1x, w1c], axis=0).astype(jnp.float32)
    ref = (jnp.maximum(feat @ w1 + b1, 0.0) * w2).sum(-1) + b2[0]
    assert jnp.allclose(y, ref, atol=2e-2, rtol=2e-2), (y, ref)

    print("KERNEL_OK")
</pallas_src>

<mosaic_0001>
module attributes {stable_mosaic.version = 11 : i64} {
  func.func @_value_mlp_kernel(%arg0: i32, %arg1: i32, %arg2: memref<8x64xf32, #tpu.memory_space<vmem>>, %arg3: memref<8x20xf32, #tpu.memory_space<vmem>>, %arg4: memref<64x256xbf16, #tpu.memory_space<vmem>>, %arg5: memref<20x256xbf16, #tpu.memory_space<vmem>>, %arg6: memref<1x256xf32, #tpu.memory_space<vmem>>, %arg7: memref<1x256xf32, #tpu.memory_space<vmem>>, %arg8: memref<1xf32, #tpu.memory_space<smem>>, %arg9: memref<8x1xf32, #tpu.memory_space<vmem>>, %arg10: memref<8x256xf32, #tpu.memory_space<vmem>>) attributes {dimension_semantics = [#tpu.dimension_semantics<parallel>, #tpu.dimension_semantics<arbitrary>], iteration_bounds = array<i64: 1, 1>, scalar_prefetch = 0 : i64, scratch_operands = 1 : i64, tpu.core_type = #tpu.core_type<tc>, window_params = [{transform_indices = @transform_0, window_bounds = array<i64: 8, 64>}, {transform_indices = @transform_1, window_bounds = array<i64: 8, 20>}, {transform_indices = @transform_2, window_bounds = array<i64: 64, 256>}, {pipeline_mode = #tpu.pipeline_mode<synchronous>, transform_indices = @transform_3, window_bounds = array<i64: 20, 256>}, {pipeline_mode = #tpu.pipeline_mode<synchronous>, transform_indices = @transform_4, window_bounds = array<i64: 1, 256>}, {pipeline_mode = #tpu.pipeline_mode<synchronous>, transform_indices = @transform_5, window_bounds = array<i64: 1, 256>}, {transform_indices = @transform_6, window_bounds = array<i64: 1>}, {transform_indices = @transform_7, window_bounds = array<i64: 8, 1>}]} {
    %c0_i32 = arith.constant 0 : i32
    %0 = arith.cmpi eq, %arg1, %c0_i32 : i32
    %1 = arith.extui %0 : i1 to i32
    %c0_i32_0 = arith.constant 0 : i32
    %2 = arith.cmpi ne, %1, %c0_i32_0 : i32
    scf.if %2 {
      %cst_10 = arith.constant 0.000000e+00 : f32
      %13 = vector.broadcast %cst_10 : f32 to vector<8x256xf32>
      %c0_11 = arith.constant 0 : index
      %c0_12 = arith.constant 0 : index
      %14 = vector.load %arg10[%c0_11, %c0_12] : memref<8x256xf32, #tpu.memory_space<vmem>>, vector<8x256xf32>
      tpu.vector_store %arg10[%c0_11, %c0_12], %13 {strides = array<i32>} : memref<8x256xf32, #tpu.memory_space<vmem>>, vector<8x256xf32>,
    } else {
    }
    %c0 = arith.constant 0 : index
    %c0_1 = arith.constant 0 : index
    %3 = vector.load %arg2[%c0, %c0_1] : memref<8x64xf32, #tpu.memory_space<vmem>>, vector<8x64xf32>
    %4 = arith.truncf %3 : vector<8x64xf32> to vector<8x64xbf16>
    %c0_2 = arith.constant 0 : index
    %c0_3 = arith.constant 0 : index
    %5 = vector.load %arg10[%c0_2, %c0_3] : memref<8x256xf32, #tpu.memory_space<vmem>>, vector<8x256xf32>
    %c0_4 = arith.constant 0 : index
    %c0_5 = arith.constant 0 : index
    %6 = vector.load %arg4[%c0_4, %c0_5] : memref<64x256xbf16, #tpu.memory_space<vmem>>, vector<64x256xbf16>
    %cst = arith.constant dense<0.000000e+00> : vector<8x256xf32>
    %7 = tpu.matmul %4, %6, %cst {dimension_numbers = #tpu.dot_dimension_numbers<[1], [0], [0], [1], [0, 0, 1, 1], [], []>} : vector<8x64xbf16>, vector<64x256xbf16>, vector<8x256xf32> -> vector<8x256xf32>
    %8 = arith.addf %5, %7 : vector<8x256xf32>
    %c0_6 = arith.constant 0 : index
    %c0_7 = arith.constant 0 : index
    %9 = vector.load %arg10[%c0_6, %c0_7] : memref<8x256xf32, #tpu.memory_space<vmem>>, vector<8x256xf32>
    tpu.vector_store %arg10[%c0_6, %c0_7], %8 {strides = array<i32>} : memref<8x256xf32, #tpu.memory_space<vmem>>, vector<8x256xf32>,
    %c0_i32_8 = arith.constant 0 : i32
    %10 = arith.cmpi eq, %arg1, %c0_i32_8 : i32
    %11 = arith.extui %10 : i1 to i32
    %c0_i32_9 = arith.constant 0 : i32
    %12 = arith.cmpi ne, %11, %c0_i32_9 : i32
    scf.if %12 {
      %c0_10 = arith.constant 0 : index
      %c0_11 = arith.constant 0 : index
      %13 = vector.load %arg3[%c0_10, %c0_11] : memref<8x20xf32, #tpu.memory_space<vmem>>, vector<8x20xf32>
      %14 = arith.truncf %13 : vector<8x20xf32> to vector<8x20xbf16>
      %c0_12 = arith.constant 0 : index
      %c0_13 = arith.constant 0 : index
      %15 = vector.load %arg10[%c0_12, %c0_13] : memref<8x256xf32, #tpu.memory_space<vmem>>, vector<8x256xf32>
      %c0_14 = arith.constant 0 : index
      %c0_15 = arith.constant 0 : index
      %16 = vector.load %arg5[%c0_14, %c0_15] : memref<20x256xbf16, #tpu.memory_space<vmem>>, vector<20x256xbf16>
      %cst_16 = arith.constant dense<0.000000e+00> : vector<8x256xf32>
      %17 = tpu.matmul %14, %16, %cst_16 {dimension_numbers = #tpu.dot_dimension_numbers<[1], [0], [0], [1], [0, 0, 1, 1], [], []>} : vector<8x20xbf16>, vector<20x256xbf16>, vector<8x256xf32> -> vector<8x256xf32>
      %18 = arith.addf %15, %17 : vector<8x256xf32>
      %c0_17 = arith.constant 0 : index
      %c0_18 = arith.constant 0 : index
      %19 = vector.load %arg6[%c0_17, %c0_18] : memref<1x256xf32, #tpu.memory_space<vmem>>, vector<1x256xf32>
      %20 = vector.broadcast %19 : vector<1x256xf32> to vector<8x256xf32>
      %21 = arith.addf %18, %20 : vector<8x256xf32>
      %cst_19 = arith.constant 0.000000e+00 : f32
      %22 = vector.broadcast %cst_19 : f32 to vector<8x256xf32>
      %23 = arith.maximumf %21, %22 : vector<8x256xf32>
      %c0_20 = arith.constant 0 : index
      %c0_21 = arith.constant 0 : index
      %24 = vector.load %arg7[%c0_20, %c0_21] : memref<1x256xf32, #tpu.memory_space<vmem>>, vector<1x256xf32>
      %25 = vector.broadcast %24 : vector<1x256xf32> to vector<8x256xf32>
      %26 = arith.mulf %23, %25 : vector<8x256xf32>
      %cst_22 = arith.constant dense<0.000000e+00> : vector<8xf32>
      %27 = vector.multi_reduction <add>, %26, %cst_22 [1] : vector<8x256xf32> to vector<8xf32>
      %28 = vector.shape_cast %27 : vector<8xf32> to vector<8x1xf32>
      %c0_23 = arith.constant 0 : index
      %29 = memref.load %arg8[%c0_23] : memref<1xf32, #tpu.memory_space<smem>>
      %30 = vector.broadcast %29 : f32 to vector<8x1xf32>
      %31 = arith.addf %28, %30 : vector<8x1xf32>
      %c0_24 = arith.constant 0 : index
      %c0_25 = arith.constant 0 : index
      %32 = vector.load %arg9[%c0_24, %c0_25] : memref<8x1xf32, #tpu.memory_space<vmem>>, vector<8x1xf32>
      tpu.vector_store %arg9[%c0_24, %c0_25], %31 {strides = array<i32>} : memref<8x1xf32, #tpu.memory_space<vmem>>, vector<8x1xf32>,
    } else {
    }
    return
  }
  func.func @transform_0(%arg0: i32, %arg1: i32) -> (i32, i32) {
    %c0_i32 = arith.constant 0 : i32
    return %arg0, %arg1 : i32, i32
  }
  func.func @transform_1(%arg0: i32, %arg1: i32) -> (i32, i32) {
    %c0_i32 = arith.constant 0 : i32
    %c0_i32_0 = arith.constant 0 : i32
    return %arg0, %c0_i32 : i32, i32
  }
  func.func @transform_2(%arg0: i32, %arg1: i32) -> (i32, i32) {
    %c0_i32 = arith.constant 0 : i32
    %c0_i32_0 = arith.constant 0 : i32
    return %arg1, %c0_i32 : i32, i32
  }
  func.func @transform_3(%arg0: i32, %arg1: i32) -> (i32, i32) {
    %c0_i32 = arith.constant 0 : i32
    %c0_i32_0 = arith.constant 0 : i32
    %c0_i32_1 = arith.constant 0 : i32
    return %c0_i32, %c0_i32_0 : i32, i32
  }
  func.func @transform_4(%arg0: i32, %arg1: i32) -> (i32, i32) {
    %c0_i32 = arith.constant 0 : i32
    %c0_i32_0 = arith.constant 0 : i32
    %c0_i32_1 = arith.constant 0 : i32
    return %c0_i32, %c0_i32_0 : i32, i32
  }
  func.func @transform_5(%arg0: i32, %arg1: i32) -> (i32, i32) {
    %c0_i32 = arith.constant 0 : i32
    %c0_i32_0 = arith.constant 0 : i32
    %c0_i32_1 = arith.constant 0 : i32
    return %c0_i32, %c0_i32_0 : i32, i32
  }
  func.func @transform_6(%arg0: i32, %arg1: i32) -> i32 {
    %c0_i32 = arith.constant 0 : i32
    %c0_i32_0 = arith.constant 0 : i32
    return %c0_i32 : i32
  }
  func.func @transform_7(%arg0: i32, %arg1: i32) -> (i32, i32) {
    %c0_i32 = arith.constant 0 : i32
    %c0_i32_0 = arith.constant 0 : i32
    return %arg0, %c0_i32 : i32, i32
  }
}

</mosaic_0001>

<bundles_post_ra>
// kernel: value_mlp_pallas.1
= control target key start
LH: loop header
LB: loop body
LE: loop exit
PB: predicated region body
PF: predicated region fallthrough
CT: control target
= control target key end

     0   :  { %13 = vsyncpa [#allocation5], 0  ;;  %s506_s0 = inlined_call_operand.hbm [shape: f32[8,64], index: 0, kind: input, shape index: {}]   ;;  %s507_s1 = inlined_call_operand.hbm [shape: f32[8,20], index: 1, kind: input, shape index: {}]   ;;  %s508_s2 = inlined_call_operand.hbm [shape: bf16[64,256], index: 2, kind: input, shape index: {}]   ;;  %s509_s3 = inlined_call_operand.hbm [shape: bf16[20,256], index: 3, kind: input, shape index: {}]   ;;  %s510_s4 = inlined_call_operand.vmem [shape: f32[1,256], index: 4, kind: input, shape index: {}]   ;;  %s511_s5 = inlined_call_operand.vmem [shape: f32[1,256], index: 5, kind: input, shape index: {}]   ;;  %s512_s6 = inlined_call_operand.<no memory space> [shape: f32[1], index: 6, kind: input, shape index: {}]   ;;  %s513_s7 = inlined_call_operand.vmem [shape: f32[8,1], index: 7, kind: output, shape index: {}]  }
   0x1   :  { %14 = vsyncpa [#allocation7], 0 }
   0x2   :  { %15 = vsyncpa [#allocation10], 0  ;;  %s435_s24 = smov [#allocation6]   ;;  %s436_s26 = smov [#allocation4]  }
   0x3   :  { %s32_s25 = sshll.u32 %s435_s24, 4  ;;  %s22_s27 = sshll.u32 %s436_s26, 4  ;;  %s33_s25 = int_to_ptr.vmem [resolvable:$true] %s32_s25  ;;  %s23_s27 = int_to_ptr.vmem [resolvable:$true] %s22_s27 }
   0x4   :  { %s357_s28 = scalar_lea.vmem %s33_s25, 128  ;;  %p362_p1 = scmp.lt.s32.totalorder %s33_s25, %s33_s25 }
   0x5   :  { %p358_p0 = scmp.ne.s32.totalorder %s33_s25, %s357_s28  ;;  %p363_p2 = scmp.lt.s32.totalorder %s357_s28, %s357_s28 }
   0x7   :  { %p364_p3 = por %p363_p2, %p362_p1 }
   0x9   :  { %p365_p4 = pnand %p364_p3, %p358_p0 }
   0xb   :  { %368 = shalt.err (!%p365_p4)
}
   0xc   :  { %35 = dma.hbm_to_vmem [thread:$0]  %s507_s1, 128, %s33_s25, [#allocation7]  }
   0xd   :  { %s377_s8 = scalar_lea.vmem %s23_s27, 128  ;;  %p382_p6 = scmp.lt.s32.totalorder %s23_s27, %s23_s27 }
   0xe   :  { %p378_p5 = scmp.ne.s32.totalorder %s23_s27, %s377_s8  ;;  %p383_p7 = scmp.lt.s32.totalorder %s377_s8, %s377_s8 }
  0x10   :  { %p384_p8 = por %p383_p7, %p382_p6 }
  0x12   :  { %p385_p9 = pnand %p384_p8, %p378_p5 }
  0x14   :  { %388 = shalt.err (!%p385_p9)
}
  0x15   :  { %25 = dma.hbm_to_vmem [thread:$0]  %s506_s0, 128, %s23_s27, [#allocation5]  }
  0x16   :  { %s437_s11 = smov [#allocation8]  }
  0x17   :  { %s41_s12 = sshll.u32 %s437_s11, 4  ;;  %s42_s12 = int_to_ptr.vmem [resolvable:$true] %s41_s12 }
  0x18   :  { %s397_s13 = scalar_lea.vmem %s42_s12, 1024  ;;  %p402_p11 = scmp.lt.s32.totalorder %s42_s12, %s42_s12 }
  0x19   :  { %p398_p10 = scmp.ne.s32.totalorder %s42_s12, %s397_s13  ;;  %p403_p12 = scmp.lt.s32.totalorder %s397_s13, %s397_s13 }
  0x1b   :  { %p404_p13 = por %p403_p12, %p402_p11 }
  0x1d   :  { %p405_p0 = pnand %p404_p13, %p398_p10 }
  0x1f   :  { %408 = shalt.err (!%p405_p0)
}
  0x20   :  { %s438_s1 = smov 128   ;;  %s439_s14 = smov 8  }
  0x21   :  { %47 = dma.hbm_to_vmem [thread:$0]  %s508_s2, 1024, %s42_s12, [#allocation7], %s438_s1, %s438_s1, %s439_s14  }
  0x22   :  { %s440_s17 = smov [#allocation9]  }
  0x23   :  { %s53_s18 = sshll.u32 %s440_s17, 4  ;;  %s54_s18 = int_to_ptr.vmem [resolvable:$true] %s53_s18 }
  0x24   :  { %s417_s0 = scalar_lea.vmem %s54_s18, 384  ;;  %p422_p2 = scmp.lt.s32.totalorder %s54_s18, %s54_s18 }
  0x25   :  { %p418_p1 = scmp.ne.s32.totalorder %s54_s18, %s417_s0  ;;  %p423_p3 = scmp.lt.s32.totalorder %s417_s0, %s417_s0 }
  0x27   :  { %p424_p4 = por %p423_p3, %p422_p2 }
  0x29   :  { %p425_p5 = pnand %p424_p4, %p418_p1 }
  0x2b   :  { %428 = shalt.err (!%p425_p5)
}
  0x2c   :  { %59 = dma.hbm_to_vmem [thread:$0]  %s509_s3, 384, %s54_s18, [#allocation10], %s438_s1, %s438_s1, %s439_s14  }
  0x2d   :  { %429 = dma.done.wait [#allocation5], 128  }
  0x2e   :  { %430 = vsyncadd [#allocation5], 4294967168 }
  0x2f   :  { %431 = dma.done.wait [#allocation7], 1152  }
  0x30   :  { %432 = vsyncadd [#allocation7], 4294966144 }
  0x31   :  { %433 = dma.done.wait [#allocation10], 384  }
  0x32   :  { %434 = vsyncadd [#allocation10], 4294966912  ;;  %v441_v0 = vmov 0   ;;  %v332_v1 = vld [vmem:[#allocation8 + $0x34] ss:$8 sps:$4 sm:$0xff]   ;;  %vm215_vm0 = vcmask 1041408   ;;  %v267_v19 = vlaneseq  ;;  %v299_v46 = vstv %s512_s6 }
  0x33   :  { %254 = vmatprep.mubr.bf16.mxu1 %v441_v0  ;;  %173 = vmatprep.mubr.bf16.mxu0 %v441_v0  ;;  %v334_v2 = vld [vmem:[#allocation8 + $0x30] ss:$8 sps:$4 sm:$0xff]   ;;  %v337_v6 = vld [vmem:[#allocation8 + $0x24] ss:$8 sps:$4 sm:$0xff]   ;;  %v339_v7 = vld [vmem:[#allocation8 + $0x20] ss:$8 sps:$4 sm:$0xff]  }
  0x34   :  { %v195_v3 = vld [vmem:[#allocation9 + $0x10] sm:$0x33]  ;;  %149 = vmatprep.subr.bf16.mxu0 %v332_v1  ;;  %v340_v8 = vld [vmem:[#allocation9 + $0x4] ss:$8 sps:$4 sm:$0xff]   ;;  %v342_v10 = vld [vmem:[#allocation9] ss:$8 sps:$4 sm:$0xff]  }
  0x35   :  { %v322_v4 = vcombine.high %v195_v3, %v195_v3  ;;  %v321_v5 = vcombine.low %v195_v3, %v195_v3  ;;  %150 = vmatpush1.bf16.msra.mxu0 %v334_v2  ;;  %v343_v11 = vld [vmem:[#allocation8 + $0x14] ss:$8 sps:$4 sm:$0xff]   ;;  %v345_v13 = vld [vmem:[#allocation8 + $0x10] ss:$8 sps:$4 sm:$0xff]   ;;  %v346_v15 = vld [vmem:[#allocation8 + $0x4] ss:$8 sps:$4 sm:$0xff]  }
  0x36   :  { %151 = vmatprep.subr.bf16.mxu0 %v337_v6  ;;  %v189_v12 = vld [vmem:[#allocation6] sm:$0xff]  ;;  %vm211_vm1 = vcmask 162816   ;;  %v348_v16 = vld [vmem:[#allocation8] ss:$8 sps:$4 sm:$0xff]   ;;  %v85_v17 = vld [vmem:[#allocation4] sm:$0xff]  ;;  %vm137_vm2 = vcmask 523264  }
  0x37   :  { %323 = vmatprep.subr.msk.bf16.mxu1 %vm215_vm0, %v322_v4  ;;  %v217_v9 = vsel %vm215_vm0, %v321_v5, 0  ;;  %v190_v14 = vpack.c.bf16 %v189_v12, %v189_v12  ;;  %v86_v18 = vpack.c.bf16 %v85_v17, %v85_v17  ;;  %v268_v20 = vshrl.u32 %v267_v19, 7  ;;  %v265_v24 = vld [vmem:[%s510_s4] sm:$0x3] }
  0x38   :  { %235 = vmatpush1.bf16.msra.mxu1 %v217_v9  ;;  %v281_v33 = vld [vmem:[%s511_s5] sm:$0x3]  ;;  %vm301_vm3 = vcmask 7168  }
  0x39   :  { %236 = vmatprep.subr.bf16.mxu1 %v340_v8  ;;  %152 = vmatpush1.bf16.msra.mxu0 %v339_v7  ;;  %v269_v22 = vsub.s32 0, %v268_v20  ;;  %v273_v25 = vsub.s32 1, %v268_v20 }
  0x3a   :  { %153 = vmatprep.subr.bf16.mxu0 %v343_v11 }
  0x3b   :  { %v270_v27 = vrot.slane %v265_v24, %v269_v22  ;;  %v274_v31 = vrot.slane %v265_v24, %v273_v25  ;;  %v286_v39 = vrot.slane %v281_v33, %v269_v22  ;;  %v290_v40 = vrot.slane %v281_v33, %v273_v25 }
  0x3c   :  { %237 = vmatpush1.bf16.msra.mxu1 %v342_v10 }
  0x3d   :  { %154 = vmatpush1.bf16.msra.mxu0 %v345_v13 }
  0x3e   :  { %155 = vmatprep.subr.bf16.mxu0 %v346_v15 }
  0x3f   :  { %324 = vmatmul.mubr.msk.bf16.vlgmr.msra.gmra.mxu1 %vm211_vm1, %v190_v14 }
  0x41   :  { %156 = vmatpush1.bf16.msra.mxu0 %v348_v16 }
  0x44   :  { %318 = vmatmul.mubr.msk.bf16.vlgmr.msra.gmra.mxu0 %vm137_vm2, %v86_v18 }
  0xff   :  { %v256_v21 = vpop.f32.mrf.mxu1 }
 0x101   :  { %v258_v23 = vpop.f32.mrf.mxu1 }
 0x103   :  { %v260_v26 = vpop.f32.mrf.mxu1 }
 0x104   :  { %v175_v28 = vpop.f32.mrf.mxu0 }
 0x105   :  { %v261_v29 = vpop.f32.mrf.mxu1  ;;  %v263_v30 = vadd.f32 %v256_v21, %v175_v28 }
 0x106   :  { %v177_v32 = vpop.f32.mrf.mxu0 }
 0x107   :  { %v277_v34 = vadd.f32 %v270_v27, %v263_v30  ;;  %v264_v35 = vadd.f32 %v258_v23, %v177_v32 }
 0x108   :  { %v179_v36 = vpop.f32.mrf.mxu0 }
 0x109   :  { %v279_v37 = vmax.f32 %v277_v34, 0.0  ;;  %v278_v38 = vadd.f32 %v274_v31, %v264_v35 }
 0x10a   :  { %v180_v41 = vpop.f32.mrf.mxu0 }
 0x10b   :  { %v280_v42 = vmax.f32 %v278_v38, 0.0  ;;  %v293_v43 = vmul.f32 %v286_v39, %v279_v37 }
 0x10d   :  { %v294_v44 = vmul.f32 %v290_v40, %v280_v42 }
 0x10f   :  { %v295_v45 = vadd.f32 %v294_v44, %v293_v43 }
 0x111   :  { %296 = vadd.xlane.f32.xlu0 %v295_v45 }
 0x19a   :  { %v297_v47 = vpop.xlane.xlu0 %296 }
 0x19b   :  { %v300_v48 = vadd.f32 %v299_v46, %v297_v47 }
 0x19d   :  { %302 = vst.msk [vmem:[%s513_s7] sm:$0xff] %vm301_vm3, %v300_v48 }
 0x19e   :  { %307 = vsyncpa [#allocation5], 1 }
 0x19f   :  { %308 = vsyncpa [#allocation7], 1 }
 0x1a0   :  { %309 = vsyncpa [#allocation10], 1 }

</bundles_post_ra>
